<compile_context>
chip_gen: v6e
topology: v6e:2x2x1
jax: 0.10.0
libtpu: 0.0.40
codegen_flags: <defaults>
</compile_context>

<pallas_src>
import functools
import math

import jax
import jax.numpy as jnp
from jax import lax
from jax.experimental import pallas as pl
from jax.experimental.pallas import tpu as pltpu


# ---------------------------------------------------------------------------
# Kernel 1: fused Q/K/V projection  [x @ Wqkv + b] on [R, H] row tiles,
# emitting q, k, v as three separate [R, H] outputs (no later HBM transpose).
# ---------------------------------------------------------------------------
def _qkv_proj_kernel(x_ref, w_ref, b_ref, q_ref, k_ref, v_ref, *, hidden_size):
    H = hidden_size
    acc = jnp.dot(x_ref[...], w_ref[...],
                  preferred_element_type=jnp.float32)          # [tm, 3H] f32
    acc = acc + b_ref[...]                                     # bias (bf16 -> f32)
    q_ref[...] = acc[:, :H].astype(q_ref.dtype)
    k_ref[...] = acc[:, H:2 * H].astype(k_ref.dtype)
    v_ref[...] = acc[:, 2 * H:].astype(v_ref.dtype)


def _qkv_projection(x, w_qkv, b_qkv, *, hidden_size, row_tile=512):
    R, H = x.shape
    H3 = w_qkv.shape[1]
    tm = min(row_tile, R)
    kernel = functools.partial(_qkv_proj_kernel, hidden_size=hidden_size)
    out_sds = jax.ShapeDtypeStruct((R, H), x.dtype)
    row_spec = pl.BlockSpec((tm, H), lambda i: (i, 0))
    return pl.pallas_call(
        kernel,
        out_shape=(out_sds, out_sds, out_sds),
        grid_spec=pltpu.PrefetchScalarGridSpec(
            num_scalar_prefetch=0,
            grid=(pl.cdiv(R, tm),),
            in_specs=[
                pl.BlockSpec((tm, H), lambda i: (i, 0)),   # activations, tiled
                # TODO(synk): pl.Buffered(1) would halve the resident weight's
                # VMEM footprint; kept at default for lowering robustness.
                pl.BlockSpec((H, H3), lambda i: (0, 0)),   # fused weight, resident
                pl.BlockSpec((1, H3), lambda i: (0, 0)),   # fused bias, resident
            ],
            out_specs=(row_spec, row_spec, row_spec),
        ),
        compiler_params=pltpu.CompilerParams(
            dimension_semantics=("parallel",),
            vmem_limit_bytes=64 * 1024 * 1024),
    )(x, w_qkv, b_qkv)


# ---------------------------------------------------------------------------
# Kernel 2: per-batch attention. All heads of one batch element per grid step.
# q/k/v arrive as [S, H] (heads interleaved along H); head split/merge is done
# in-VMEM, output is a single lane-dense [S, H] store.
# ---------------------------------------------------------------------------
def _attention_body(scale, nh, d, q, k, v, mask_row):
    # q, k, v: [S, H] (compute dtype, e.g. bf16); mask_row: [1, S] f32 or None.
    qs = q * scale                                  # fold 1/sqrt(d) into q (S*H mults)
    ctxs = []
    for h in range(nh):                             # statically unrolled over heads
        lo, hi = h * d, (h + 1) * d
        qh = qs[:, lo:hi]                           # [S, d]
        kh = k[:, lo:hi]                            # [S, d]
        vh = v[:, lo:hi]                            # [S, d]
        # q @ k^T contracting the head dim of both (no transpose), f32 acc.
        scores = lax.dot_general(
            qh, kh, (((1,), (1,)), ((), ())),
            preferred_element_type=jnp.float32)     # [S, S] f32
        if mask_row is not None:
            scores = scores + mask_row              # broadcast [1, S] over rows
        m = jnp.max(scores, axis=-1, keepdims=True)
        p = jnp.exp(scores - m)                     # f32 softmax numerics
        l = jnp.sum(p, axis=-1, keepdims=True)
        p = p * pl.reciprocal(l, approx=True)       # divide -> EUP slot
        ctx = jnp.dot(p.astype(vh.dtype), vh,
                      preferred_element_type=jnp.float32)      # [S, d] f32
        ctxs.append(ctx)
    return jnp.concatenate(ctxs, axis=-1)           # [S, H] f32 (head merge in-VMEM)


def _attn_kernel_masked(scale, nh, d, q_ref, k_ref, v_ref, m_ref, o_ref):
    ctx = _attention_body(scale, nh, d, q_ref[0], k_ref[0], v_ref[0], m_ref[0])
    o_ref[0] = ctx.astype(o_ref.dtype)


def _attn_kernel_nomask(scale, nh, d, q_ref, k_ref, v_ref, o_ref):
    ctx = _attention_body(scale, nh, d, q_ref[0], k_ref[0], v_ref[0], None)
    o_ref[0] = ctx.astype(o_ref.dtype)


def albert_self_attention(hidden_states, w_qkv, b_qkv, *, num_attention_heads,
                          attention_mask=None, row_tile=512,
                          compute_dtype=jnp.bfloat16):
    """hidden_states: [B, S, H]. w_qkv: [H, 3H] fused (in x out), b_qkv: [3H].
    attention_mask: optional additive mask broadcastable to [B, 1, 1, S]."""
    B, S, H = hidden_states.shape
    nh = num_attention_heads
    d = H // nh
    assert nh * d == H, "hidden_size must be divisible by num_attention_heads"
    out_dtype = hidden_states.dtype

    # ---- Kernel 1: fused QKV projection over [B*S, H] rows (bf16 in, f32 acc).
    x = hidden_states.reshape(B * S, H).astype(compute_dtype)
    w = w_qkv.astype(compute_dtype)
    b = b_qkv.reshape(1, 3 * H).astype(compute_dtype)
    q, k, v = _qkv_projection(x, w, b, hidden_size=H, row_tile=row_tile)

    # Free reshapes only (no HBM transposes).
    q = q.reshape(B, S, H)
    k = k.reshape(B, S, H)
    v = v.reshape(B, S, H)

    scale = 1.0 / math.sqrt(d)          # plain Python float -> literal
    qkv_spec = pl.BlockSpec((1, S, H), lambda i: (i, 0, 0))

    if attention_mask is not None:
        # HF-style key mask: keep it as [B, 1, S]; broadcast happens in-kernel.
        mask = jnp.broadcast_to(jnp.asarray(attention_mask, jnp.float32),
                                (B, 1, 1, S)).reshape(B, 1, S)
        kernel = functools.partial(_attn_kernel_masked, scale, nh, d)
        in_specs = [qkv_spec, qkv_spec, qkv_spec,
                    pl.BlockSpec((1, 1, S), lambda i: (i, 0, 0))]
        args = (q, k, v, mask)
    else:
        kernel = functools.partial(_attn_kernel_nomask, scale, nh, d)
        in_specs = [qkv_spec, qkv_spec, qkv_spec]
        args = (q, k, v)

    ctx = pl.pallas_call(
        kernel,
        out_shape=jax.ShapeDtypeStruct((B, S, H), out_dtype),
        grid_spec=pltpu.PrefetchScalarGridSpec(
            num_scalar_prefetch=0,
            grid=(B,),
            in_specs=in_specs,
            out_specs=pl.BlockSpec((1, S, H), lambda i: (i, 0, 0)),
        ),
        compiler_params=pltpu.CompilerParams(
            dimension_semantics=("parallel",)),
    )(*args)
    return ctx


# ---------------------------------------------------------------------------
# Params (fused weights built once, outside the per-call path) + reference.
# ---------------------------------------------------------------------------
def make_params(key, hidden_size):
    ks = jax.random.split(key, 6)
    init = lambda k: 0.02 * jax.random.normal(k, (hidden_size, hidden_size),
                                              jnp.float32)
    binit = lambda k: 0.02 * jax.random.normal(k, (hidden_size,), jnp.float32)
    return dict(w_q=init(ks[0]), w_k=init(ks[1]), w_v=init(ks[2]),
                b_q=binit(ks[3]), b_k=binit(ks[4]), b_v=binit(ks[5]))


def fuse_qkv_params(params):
    w_qkv = jnp.concatenate([params["w_q"], params["w_k"], params["w_v"]],
                            axis=1)                               # [H, 3H]
    b_qkv = jnp.concatenate([params["b_q"], params["b_k"], params["b_v"]])  # [3H]
    return w_qkv, b_qkv


def _reference(hidden_states, params, num_attention_heads, attention_mask=None):
    B, S, H = hidden_states.shape
    nh = num_attention_heads
    d = H // nh
    q = hidden_states @ params["w_q"] + params["b_q"]
    k = hidden_states @ params["w_k"] + params["b_k"]
    v = hidden_states @ params["w_v"] + params["b_v"]
    split = lambda t: t.reshape(B, S, nh, d).transpose(0, 2, 1, 3)
    q, k, v = split(q), split(k), split(v)
    scores = jnp.einsum("bhqd,bhkd->bhqk", q, k) / math.sqrt(d)
    if attention_mask is not None:
        scores = scores + attention_mask
    probs = jax.nn.softmax(scores, axis=-1)
    ctx = jnp.einsum("bhqk,bhkd->bhqd", probs, v)
    return ctx.transpose(0, 2, 1, 3).reshape(B, S, H)


if __name__ == "__main__":
    # Small ALBERT-like config.
    B, S, H, NH = 2, 8, 32, 4

    key = jax.random.PRNGKey(0)
    kp, kx, km = jax.random.split(key, 3)
    params = make_params(kp, H)
    w_qkv, b_qkv = fuse_qkv_params(params)      # fused once, not per forward call
    hidden_states = jax.random.normal(kx, (B, S, H), jnp.float32)

    # Case 1: no attention mask (module's default forward call).
    out = albert_self_attention(hidden_states, w_qkv, b_qkv,
                                num_attention_heads=NH)
    out = jax.block_until_ready(out)
    ref = _reference(hidden_states, params, NH)
    assert out.shape == (B, S, H)
    assert jnp.allclose(out, ref, atol=2e-2, rtol=2e-2), \
        float(jnp.max(jnp.abs(out - ref)))

    # Case 2: HF-style additive attention mask [B, 1, 1, S].
    keep = (jax.random.uniform(km, (B, S)) > 0.3).astype(jnp.float32)
    keep = keep.at[:, 0].set(1.0)                       # never mask everything
    add_mask = (1.0 - keep)[:, None, None, :] * -10000.0
    out_m = albert_self_attention(hidden_states, w_qkv, b_qkv,
                                  num_attention_heads=NH,
                                  attention_mask=add_mask)
    out_m = jax.block_until_ready(out_m)
    ref_m = _reference(hidden_states, params, NH, attention_mask=add_mask)
    assert jnp.allclose(out_m, ref_m, atol=2e-2, rtol=2e-2), \
        float(jnp.max(jnp.abs(out_m - ref_m)))

    print("KERNEL_OK")
</pallas_src>

<mosaic_0001>
module attributes {stable_mosaic.version = 11 : i64} {
  func.func @_qkv_proj_kernel(%arg0: i32, %arg1: memref<16x32xbf16, #tpu.memory_space<vmem>>, %arg2: memref<32x96xbf16, #tpu.memory_space<vmem>>, %arg3: memref<1x96xbf16, #tpu.memory_space<vmem>>, %arg4: memref<16x32xbf16, #tpu.memory_space<vmem>>, %arg5: memref<16x32xbf16, #tpu.memory_space<vmem>>, %arg6: memref<16x32xbf16, #tpu.memory_space<vmem>>) attributes {dimension_semantics = [#tpu.dimension_semantics<parallel>], iteration_bounds = array<i64: 1>, scalar_prefetch = 0 : i64, scratch_operands = 0 : i64, tpu.core_type = #tpu.core_type<tc>, window_params = [{transform_indices = @transform_0, window_bounds = array<i64: 16, 32>}, {pipeline_mode = #tpu.pipeline_mode<synchronous>, transform_indices = @transform_1, window_bounds = array<i64: 32, 96>}, {pipeline_mode = #tpu.pipeline_mode<synchronous>, transform_indices = @transform_2, window_bounds = array<i64: 1, 96>}, {transform_indices = @transform_3, window_bounds = array<i64: 16, 32>}, {transform_indices = @transform_4, window_bounds = array<i64: 16, 32>}, {transform_indices = @transform_5, window_bounds = array<i64: 16, 32>}]} {
    %c0 = arith.constant 0 : index
    %c0_0 = arith.constant 0 : index
    %0 = vector.load %arg1[%c0, %c0_0] : memref<16x32xbf16, #tpu.memory_space<vmem>>, vector<16x32xbf16>
    %c0_1 = arith.constant 0 : index
    %c0_2 = arith.constant 0 : index
    %1 = vector.load %arg2[%c0_1, %c0_2] : memref<32x96xbf16, #tpu.memory_space<vmem>>, vector<32x96xbf16>
    %cst = arith.constant dense<0.000000e+00> : vector<16x96xf32>
    %2 = tpu.matmul %0, %1, %cst {dimension_numbers = #tpu.dot_dimension_numbers<[1], [0], [0], [1], [0, 0, 1, 1], [], []>} : vector<16x32xbf16>, vector<32x96xbf16>, vector<16x96xf32> -> vector<16x96xf32>
    %c0_3 = arith.constant 0 : index
    %c0_4 = arith.constant 0 : index
    %3 = vector.load %arg3[%c0_3, %c0_4] : memref<1x96xbf16, #tpu.memory_space<vmem>>, vector<1x96xbf16>
    %4 = arith.extf %3 : vector<1x96xbf16> to vector<1x96xf32>
    %5 = vector.broadcast %4 : vector<1x96xf32> to vector<16x96xf32>
    %6 = arith.addf %2, %5 : vector<16x96xf32>
    %7 = vector.extract_strided_slice %6 {offsets = [0, 0], sizes = [16, 32], strides = [1, 1]} : vector<16x96xf32> to vector<16x32xf32>
    %8 = arith.truncf %7 : vector<16x32xf32> to vector<16x32xbf16>
    %c0_5 = arith.constant 0 : index
    %c0_6 = arith.constant 0 : index
    %9 = vector.load %arg4[%c0_5, %c0_6] : memref<16x32xbf16, #tpu.memory_space<vmem>>, vector<16x32xbf16>
    tpu.vector_store %arg4[%c0_5, %c0_6], %8 {strides = array<i32>} : memref<16x32xbf16, #tpu.memory_space<vmem>>, vector<16x32xbf16>,
    %10 = vector.extract_strided_slice %6 {offsets = [0, 32], sizes = [16, 32], strides = [1, 1]} : vector<16x96xf32> to vector<16x32xf32>
    %11 = arith.truncf %10 : vector<16x32xf32> to vector<16x32xbf16>
    %c0_7 = arith.constant 0 : index
    %c0_8 = arith.constant 0 : index
    %12 = vector.load %arg5[%c0_7, %c0_8] : memref<16x32xbf16, #tpu.memory_space<vmem>>, vector<16x32xbf16>
    tpu.vector_store %arg5[%c0_7, %c0_8], %11 {strides = array<i32>} : memref<16x32xbf16, #tpu.memory_space<vmem>>, vector<16x32xbf16>,
    %13 = vector.extract_strided_slice %6 {offsets = [0, 64], sizes = [16, 32], strides = [1, 1]} : vector<16x96xf32> to vector<16x32xf32>
    %14 = arith.truncf %13 : vector<16x32xf32> to vector<16x32xbf16>
    %c0_9 = arith.constant 0 : index
    %c0_10 = arith.constant 0 : index
    %15 = vector.load %arg6[%c0_9, %c0_10] : memref<16x32xbf16, #tpu.memory_space<vmem>>, vector<16x32xbf16>
    tpu.vector_store %arg6[%c0_9, %c0_10], %14 {strides = array<i32>} : memref<16x32xbf16, #tpu.memory_space<vmem>>, vector<16x32xbf16>,
    return
  }
  func.func @transform_0(%arg0: i32) -> (i32, i32) {
    %c0_i32 = arith.constant 0 : i32
    %c0_i32_0 = arith.constant 0 : i32
    return %arg0, %c0_i32 : i32, i32
  }
  func.func @transform_1(%arg0: i32) -> (i32, i32) {
    %c0_i32 = arith.constant 0 : i32
    %c0_i32_0 = arith.constant 0 : i32
    %c0_i32_1 = arith.constant 0 : i32
    return %c0_i32, %c0_i32_0 : i32, i32
  }
  func.func @transform_2(%arg0: i32) -> (i32, i32) {
    %c0_i32 = arith.constant 0 : i32
    %c0_i32_0 = arith.constant 0 : i32
    %c0_i32_1 = arith.constant 0 : i32
    return %c0_i32, %c0_i32_0 : i32, i32
  }
  func.func @transform_3(%arg0: i32) -> (i32, i32) {
    %c0_i32 = arith.constant 0 : i32
    %c0_i32_0 = arith.constant 0 : i32
    return %arg0, %c0_i32 : i32, i32
  }
  func.func @transform_4(%arg0: i32) -> (i32, i32) {
    %c0_i32 = arith.constant 0 : i32
    %c0_i32_0 = arith.constant 0 : i32
    return %arg0, %c0_i32 : i32, i32
  }
  func.func @transform_5(%arg0: i32) -> (i32, i32) {
    %c0_i32 = arith.constant 0 : i32
    %c0_i32_0 = arith.constant 0 : i32
    return %arg0, %c0_i32 : i32, i32
  }
}

</mosaic_0001>

<bundles_post_ra>
// kernel: tpu_custom_call.1
= control target key start
LH: loop header
LB: loop body
LE: loop exit
PB: predicated region body
PF: predicated region fallthrough
CT: control target
= control target key end

     0   :  { %11 = vsyncpa [#allocation3], 0  ;;  %s419_s0 = inlined_call_operand.hbm [shape: bf16[16,32], index: 0, kind: input, shape index: {}]   ;;  %s420_s1 = inlined_call_operand.hbm [shape: bf16[32,96], index: 1, kind: input, shape index: {}]   ;;  %s421_s2 = inlined_call_operand.vmem [shape: bf16[1,96], index: 2, kind: input, shape index: {}]   ;;  %s422_s3 = inlined_call_operand.hbm [shape: bf16[16,32], index: 3, kind: output, shape index: {0}]   ;;  %s423_s4 = inlined_call_operand.hbm [shape: bf16[16,32], index: 4, kind: output, shape index: {1}]   ;;  %s424_s5 = inlined_call_operand.hbm [shape: bf16[16,32], index: 5, kind: output, shape index: {2}]  }
   0x1   :  { %12 = vsyncpa [#allocation6], 0 }
   0x2   :  { %13 = vsyncpa [#allocation4], 0 }
   0x3   :  { %14 = vsyncpa [#allocation9], 0  ;;  %s338_s18 = smov [#allocation2]  }
   0x4   :  { %s20_s19 = sshll.u32 %s338_s18, 4  ;;  %s21_s19 = int_to_ptr.vmem [resolvable:$true] %s20_s19 }
   0x5   :  { %s238_s20 = scalar_lea.vmem %s21_s19, 128  ;;  %p243_p1 = scmp.lt.s32.totalorder %s21_s19, %s21_s19 }
   0x6   :  { %p239_p0 = scmp.ne.s32.totalorder %s21_s19, %s238_s20  ;;  %p244_p2 = scmp.lt.s32.totalorder %s238_s20, %s238_s20 }
   0x8   :  { %p245_p3 = por %p244_p2, %p243_p1 }
   0xa   :  { %p246_p4 = pnand %p245_p3, %p239_p0 }
   0xc   :  { %249 = shalt.err (!%p246_p4)
}
   0xd   :  { %s339_s21 = smov 64   ;;  %s340_s22 = smov 4  }
   0xe   :  { %26 = dma.hbm_to_vmem [thread:$0]  %s419_s0, 128, %s21_s19, [#allocation3], %s339_s21, %s339_s21, %s340_s22  }
   0xf   :  { %s341_s25 = smov [#allocation5]  }
  0x10   :  { %s32_s26 = sshll.u32 %s341_s25, 4  ;;  %s33_s26 = int_to_ptr.vmem [resolvable:$true] %s32_s26 }
  0x11   :  { %s258_s27 = scalar_lea.vmem %s33_s26, 256  ;;  %p263_p6 = scmp.lt.s32.totalorder %s33_s26, %s33_s26 }
  0x12   :  { %p259_p5 = scmp.ne.s32.totalorder %s33_s26, %s258_s27  ;;  %p264_p7 = scmp.lt.s32.totalorder %s258_s27, %s258_s27 }
  0x14   :  { %p265_p8 = por %p264_p7, %p263_p6 }
  0x16   :  { %p266_p9 = pnand %p265_p8, %p259_p5 }
  0x18   :  { %269 = shalt.err (!%p266_p9)
}
  0x19   :  { %38 = dma.hbm_to_vmem [thread:$0]  %s420_s1, 256, %s33_s26, [#allocation6], %s339_s21, %s339_s21, %s340_s22  }
  0x1a   :  { %330 = dma.done.wait [#allocation3], 128  }
  0x1b   :  { %331 = vsyncadd [#allocation3], 4294967168 }
  0x1c   :  { %332 = dma.done.wait [#allocation6], 256  }
  0x1d   :  { %333 = vsyncadd [#allocation6], 4294967040  ;;  %v342_v0 = vmov 0.0   ;;  %vm343_vm0 = vmmov 0   ;;  %v227_v1 = vld [vmem:[#allocation5 + $0x8] sm:$0xff]   ;;  %v228_v2 = vld [vmem:[#allocation5] sm:$0xff]   ;;  %v56_v4 = vlaneseq }
  0x1e   :  { %209 = vmatprep.subr.bf16.mxu0 %v342_v0  ;;  %213 = vmatprep.mubr.msk.bf16.mxu0 %vm343_vm0, %v342_v0  ;;  %v229_v3 = vld [vmem:[#allocation2] sm:$0xff]   ;;  %vm77_vm1 = vcmask 261120   ;;  %vm130_vm2 = vcmask 257024   ;;  %s344_s30 = smov [#allocation7]   ;;  %s345_s7 = smov 96  }
  0x1f   :  { %210 = vmatpush3.bf16.msra.mxu0 %v227_v1  ;;  %v57_v5 = vshrl.u32 %v56_v4, 7  ;;  %v54_v6 = vld [vmem:[%s421_s2] sm:$0x1]  ;;  %s154_s6 = sshll.u32 %s344_s30, 4  ;;  %s155_s6 = int_to_ptr.vmem [resolvable:$true] %s154_s6 }
  0x20   :  { %211 = vmatprep.subr.bf16.mxu0 %v342_v0  ;;  %v55_v7 = vunpack.c.l.bf16 %v54_v6  ;;  %s270_s2 = scalar_lea.vmem %s155_s6, 128  ;;  %p275_p11 = scmp.lt.s32.totalorder %s155_s6, %s155_s6 }
  0x21   :  { %v58_v8 = vsub.s32 0, %v57_v5  ;;  %p271_p10 = scmp.ne.s32.totalorder %s155_s6, %s270_s2  ;;  %p276_p12 = scmp.lt.s32.totalorder %s270_s2, %s270_s2 }
  0x23   :  { %212 = vmatpush3.bf16.msra.mxu0 %v228_v2  ;;  %v59_v9 = vrot.slane %v55_v7, %v58_v8  ;;  %p277_p13 = por %p276_p12, %p275_p11 }
  0x25   :  { %p278_p0 = pnand %p277_p13, %p271_p10 }
  0x26   :  { %214 = vmatmul.mubr.msk.bf16.vlgmr.msra.gmra.mxu0 %vm77_vm1, %v229_v3 }
  0xe6   :  { %v115_v10 = vpop.f32.mrf.mxu0 }
  0xe7   :  { %v116_v11 = vadd.f32 %v115_v10, %v59_v9 }
  0xe8   :  { %v215_v12 = vpop.f32.mrf.mxu0 }
  0xe9   :  { %v204_v13 = vpack.c.bf16 %v116_v11, %v116_v11 }
  0xea   :  { %v118_v14 = vpop.f32.mrf.mxu0 }
  0xeb   :  { %v119_v15 = vadd.f32 %v118_v14, %v59_v9  ;;  %141 = vrot.lane.b32.xlu1 %v204_v13, %s339_s21  ;;  %133 = vrot.lane.b32.xlu0 %v204_v13, %s345_s7  ;;  %131 = vst.msk [vmem:[#allocation7] sm:$0xf] %vm130_vm2, %v204_v13 }
  0xec   :  { %v216_v16 = vpop.f32.mrf.mxu0 }
  0xed   :  { %v205_v17 = vpack.c.bf16 %v119_v15, %v119_v15 }
  0xef   :  { %143 = vrot.lane.b32.xlu1 %v205_v17, %s339_s21  ;;  %135 = vrot.lane.b32.xlu0 %v205_v17, %s345_s7  ;;  %132 = vst.msk [vmem:[#allocation7 + $0x4] sm:$0xf] %vm130_vm2, %v205_v17 }
  0xf0   :  { %281 = shalt.err (!%p278_p0)
}
  0xf1   :  { %160 = dma.vmem_to_hbm [thread:$0]  %s155_s6, 128, %s422_s3, [#allocation4], %s339_s21, %s339_s21, %s340_s22  }
  0xf2   :  { %s346_s10 = smov [#allocation8]   ;;  %s347_s12 = smov [#allocation10]  }
  0xf3   :  { %s166_s11 = sshll.u32 %s346_s10, 4  ;;  %s178_s13 = sshll.u32 %s347_s12, 4  ;;  %s167_s11 = int_to_ptr.vmem [resolvable:$true] %s166_s11  ;;  %s179_s13 = int_to_ptr.vmem [resolvable:$true] %s178_s13 }
  0xf4   :  { %s290_s14 = scalar_lea.vmem %s167_s11, 128  ;;  %p295_p2 = scmp.lt.s32.totalorder %s167_s11, %s167_s11 }
  0xf5   :  { %p291_p1 = scmp.ne.s32.totalorder %s167_s11, %s290_s14  ;;  %p296_p3 = scmp.lt.s32.totalorder %s290_s14, %s290_s14 }
  0xf7   :  { %p297_p4 = por %p296_p3, %p295_p2 }
  0xf9   :  { %p298_p5 = pnand %p297_p4, %p291_p1 }
 0x15d   :  { %v142_v18 = vpop.permute.xlu1 %141  ;;  %v134_v19 = vpop.permute.xlu0 %133 }
 0x15e   :  { %147 = vst.msk [vmem:[#allocation10] sm:$0xf] %vm130_vm2, %v142_v18  ;;  %139 = vst.msk [vmem:[#allocation8] sm:$0xf] %vm130_vm2, %v134_v19 }
 0x161   :  { %v144_v20 = vpop.permute.xlu1 %143  ;;  %v136_v21 = vpop.permute.xlu0 %135 }
 0x162   :  { %148 = vst.msk [vmem:[#allocation10 + $0x4] sm:$0xf] %vm130_vm2, %v144_v20  ;;  %140 = vst.msk [vmem:[#allocation8 + $0x4] sm:$0xf] %vm130_vm2, %v136_v21 }
 0x163   :  { %301 = shalt.err (!%p298_p5)
}
 0x164   :  { %172 = dma.vmem_to_hbm [thread:$0]  %s167_s11, 128, %s423_s4, [#allocation9], %s339_s21, %s339_s21, %s340_s22  }
 0x165   :  { %s310_s16 = scalar_lea.vmem %s179_s13, 128  ;;  %p315_p7 = scmp.lt.s32.totalorder %s179_s13, %s179_s13 }
 0x166   :  { %p311_p6 = scmp.ne.s32.totalorder %s179_s13, %s310_s16  ;;  %p316_p8 = scmp.lt.s32.totalorder %s310_s16, %s310_s16 }
 0x168   :  { %p317_p9 = por %p316_p8, %p315_p7 }
 0x16a   :  { %p318_p10 = pnand %p317_p9, %p311_p6 }
 0x16c   :  { %321 = shalt.err (!%p318_p10)
}
 0x16d   :  { %184 = dma.vmem_to_hbm [thread:$0]  %s179_s13, 128, %s424_s5, [#allocation9], %s339_s21, %s339_s21, %s340_s22  }
 0x16e   :  { %334 = dma.done.wait [#allocation4], 128  }
 0x16f   :  { %335 = vsyncadd [#allocation4], 4294967168 }
 0x170   :  { %336 = dma.done.wait [#allocation9], 256  }
 0x171   :  { %337 = vsyncadd [#allocation9], 4294967040 }
 0x172   :  { %194 = vsyncpa [#allocation3], 1 }
 0x173   :  { %195 = vsyncpa [#allocation6], 1 }
 0x174   :  { %196 = vsyncpa [#allocation4], 1 }
 0x175   :  { %197 = vsyncpa [#allocation9], 1 }

</bundles_post_ra>
